<compile_context>
chip_gen: v5e
topology: v5e:2x2
jax: 0.10.0
libtpu: 0.0.40
codegen_flags: <defaults>
</compile_context>

<pallas_src>
import functools

import jax
import jax.numpy as jnp
from jax import lax
from jax.experimental import pallas as pl
from jax.experimental.pallas import tpu as pltpu


# ----------------------------- fused Pallas kernel ---------------------------

def _make_textcnn_kernel(*, B, S, E, V, F, region_sizes):
    """Builds the fused TextCNN kernel for static shapes."""
    M = B * S                      # batch folded into the matmul M dimension
    r_max = max(region_sizes)
    M_pad = M + r_max - 1          # padding rows so shifted windows keep shape
    n_r = len(region_sizes)

    def kernel(ids_ref, pos_ref, emb_ref, *rest):
        # rest = [w_r, b_r] * n_r, w_lin, b_lin, o_ref, xs_scratch
        conv_refs = rest[: 2 * n_r]
        w_lin_ref = rest[2 * n_r]
        b_lin_ref = rest[2 * n_r + 1]
        o_ref = rest[2 * n_r + 2]
        xs_ref = rest[2 * n_r + 3]

        # ---- in-kernel embedding gather (one-hot matmul; table fits VMEM) ----
        ids = ids_ref[...]                                          # (M, 1) i32
        iota_v = lax.broadcasted_iota(jnp.int32, (M, V), 1)         # (M, V)
        onehot = (iota_v == ids).astype(jnp.float32)                # (M, V)
        x = jnp.dot(onehot, emb_ref[...],
                    preferred_element_type=jnp.float32)             # (M, E) f32

        # Stash embeddings with r_max-1 zero rows of padding so every shifted
        # window xs[i : i+M] has the same (M, E) shape.
        xs_ref[0:M, :] = x
        if M_pad > M:
            xs_ref[M:M_pad, :] = jnp.zeros((M_pad - M, E), jnp.float32)

        # Shifted views (in-kernel "unfold"): row m of x_shift[i] is token m+i.
        x_shift = [xs_ref[i:i + M, :].astype(jnp.bfloat16) for i in range(r_max)]

        pos = pos_ref[...]                                          # (M, 1) i32
        feats = []
        for k, r in enumerate(region_sizes):
            w_ref = conv_refs[2 * k]        # (r*E, F) bf16
            b_ref = conv_refs[2 * k + 1]    # (1, F)   f32
            # conv == sum over the r window offsets of (M,E)@(E,F) matmuls
            acc = jnp.dot(x_shift[0], w_ref[0:E, :],
                          preferred_element_type=jnp.float32)       # (M, F)
            for i in range(1, r):
                acc = acc + jnp.dot(x_shift[i], w_ref[i * E:(i + 1) * E, :],
                                    preferred_element_type=jnp.float32)
            z = jnp.maximum(acc + b_ref[...], 0.0)                  # bias + ReLU
            # Mask rows whose window crosses a batch boundary; post-ReLU
            # zero-masking is exact since relu >= 0 and valid rows exist.
            z = jnp.where(pos <= (S - r), z, 0.0)
            # Global max-pool over time per batch element.
            feats.append(jnp.max(z.reshape(B, S, F), axis=1))       # (B, F)

        x_feat = jnp.concatenate(feats, axis=-1)                    # (B, n_r*F)
        # TODO(synk): dropout is identity in eval mode; training dropout not implemented.
        logits = jnp.dot(x_feat.astype(jnp.bfloat16), w_lin_ref[...],
                         preferred_element_type=jnp.float32) + b_lin_ref[...]
        o_ref[...] = logits                                         # (B, C_pad)

    return kernel


# ------------------------------ model wrapper --------------------------------

def init_params(key, *, vocab_size, embedding_dim, num_filters, region_sizes,
                num_classes, padding_idx=0):
    n_r = len(region_sizes)
    keys = jax.random.split(key, 3 + 2 * n_r)

    emb = 0.02 * jax.random.normal(keys[0], (vocab_size, embedding_dim), jnp.float32)
    if padding_idx is not None:
        emb = emb.at[padding_idx].set(0.0)   # nn.Embedding(padding_idx=...) zeros that row

    convs = []
    for idx, r in enumerate(region_sizes):
        kw, kb = keys[1 + 2 * idx], keys[2 + 2 * idx]
        # torch Conv2d weight (F, 1, r, E); flatten (r, E) row-major -> (r*E, F)
        w_conv = 0.05 * jax.random.normal(kw, (num_filters, 1, r, embedding_dim),
                                          jnp.float32)
        w_mat = w_conv.reshape(num_filters, r * embedding_dim).T.astype(jnp.bfloat16)
        b = 0.01 * jax.random.normal(kb, (1, num_filters), jnp.float32)
        convs.append((w_mat, b))

    d = num_filters * n_r
    c_pad = ((num_classes + 127) // 128) * 128          # lane-dense output slab
    w_lin = 0.05 * jax.random.normal(keys[-2], (d, num_classes), jnp.float32)
    b_lin = 0.01 * jax.random.normal(keys[-1], (1, num_classes), jnp.float32)
    w_lin_pad = (jnp.zeros((d, c_pad), jnp.float32)
                 .at[:, :num_classes].set(w_lin).astype(jnp.bfloat16))
    b_lin_pad = jnp.zeros((1, c_pad), jnp.float32).at[:, :num_classes].set(b_lin)

    return {"embedding": emb, "convs": convs, "linear": (w_lin_pad, b_lin_pad),
            "region_sizes": tuple(region_sizes), "num_classes": num_classes}


def textcnn_forward(params, token_ids):
    """token_ids: (B, S) int32 -> logits (B, num_classes) f32."""
    emb = params["embedding"]
    V, E = emb.shape
    B, S = token_ids.shape
    region_sizes = params["region_sizes"]
    convs = params["convs"]
    w_lin, b_lin = params["linear"]
    F_ = convs[0][0].shape[1]
    C_pad = w_lin.shape[1]
    M = B * S
    r_max = max(region_sizes)

    ids = token_ids.reshape(M, 1).astype(jnp.int32)
    pos = jnp.broadcast_to(jnp.arange(S, dtype=jnp.int32)[None, :], (B, S)).reshape(M, 1)

    kernel = _make_textcnn_kernel(B=B, S=S, E=E, V=V, F=F_, region_sizes=region_sizes)

    conv_args = [a for wb in convs for a in wb]
    n_in = 3 + len(conv_args) + 2
    out = pl.pallas_call(
        kernel,
        out_shape=jax.ShapeDtypeStruct((B, C_pad), jnp.float32),
        in_specs=[pl.BlockSpec(memory_space=pltpu.MemorySpace.VMEM)] * n_in,
        out_specs=pl.BlockSpec(memory_space=pltpu.MemorySpace.VMEM),
        scratch_shapes=[pltpu.VMEM((M + r_max - 1, E), jnp.float32)],
    )(ids, pos, emb, *conv_args, w_lin, b_lin)

    return out[:, :params["num_classes"]]


# ------------------------------ pure-JAX reference ---------------------------

def textcnn_reference(params, token_ids):
    x = jnp.take(params["embedding"], token_ids, axis=0)            # (B, S, E)
    B, S, E = x.shape
    feats = []
    for r, (w, b) in zip(params["region_sizes"], params["convs"]):
        T = S - r + 1
        x_unf = jnp.concatenate([x[:, i:i + T, :] for i in range(r)], axis=-1)
        y = jnp.einsum("btk,kf->btf", x_unf, w.astype(jnp.float32)) + b
        feats.append(jnp.max(jax.nn.relu(y), axis=1))
    xf = jnp.concatenate(feats, axis=-1)
    w_lin, b_lin = params["linear"]
    out = xf @ w_lin.astype(jnp.float32) + b_lin
    return out[:, :params["num_classes"]]


# --------------------------------- main ---------------------------------------

if __name__ == "__main__":
    B, S = 2, 16
    vocab_size = 100
    embedding_dim = 32
    num_filters = 128
    region_sizes = (2, 3, 4)
    num_classes = 8

    key = jax.random.PRNGKey(0)
    k_params, k_inputs = jax.random.split(key)

    params = init_params(
        k_params,
        vocab_size=vocab_size,
        embedding_dim=embedding_dim,
        num_filters=num_filters,
        region_sizes=region_sizes,
        num_classes=num_classes,
        padding_idx=0,
    )
    token_ids = jax.random.randint(k_inputs, (B, S), 0, vocab_size, jnp.int32)

    fwd = jax.jit(functools.partial(textcnn_forward, params))
    logits = fwd(token_ids)
    jax.block_until_ready(logits)
    assert logits.shape == (B, num_classes)

    ref = textcnn_reference(params, token_ids)
    assert jnp.allclose(logits, ref, rtol=5e-2, atol=5e-3), (logits, ref)
    print("KERNEL_OK")
</pallas_src>

<mosaic_0001>
module attributes {stable_mosaic.version = 11 : i64} {
  func.func @kernel(%arg0: memref<32x1xi32, #tpu.memory_space<vmem>>, %arg1: memref<32x1xi32, #tpu.memory_space<vmem>>, %arg2: memref<100x32xf32, #tpu.memory_space<vmem>>, %arg3: memref<64x128xbf16, #tpu.memory_space<vmem>>, %arg4: memref<1x128xf32, #tpu.memory_space<vmem>>, %arg5: memref<96x128xbf16, #tpu.memory_space<vmem>>, %arg6: memref<1x128xf32, #tpu.memory_space<vmem>>, %arg7: memref<128x128xbf16, #tpu.memory_space<vmem>>, %arg8: memref<1x128xf32, #tpu.memory_space<vmem>>, %arg9: memref<384x128xbf16, #tpu.memory_space<vmem>>, %arg10: memref<1x128xf32, #tpu.memory_space<vmem>>, %arg11: memref<2x128xf32, #tpu.memory_space<vmem>>, %arg12: memref<35x32xf32, #tpu.memory_space<vmem>>) attributes {dimension_semantics = [], scalar_prefetch = 0 : i64, scratch_operands = 1 : i64, tpu.core_type = #tpu.core_type<tc>} {
    %c0 = arith.constant 0 : index
    %c0_0 = arith.constant 0 : index
    %0 = vector.load %arg0[%c0, %c0_0] : memref<32x1xi32, #tpu.memory_space<vmem>>, vector<32x1xi32>
    %1 = tpu.iota {dimensions = array<i32: 1>} : vector<32x100xi32>
    %2 = vector.broadcast %0 : vector<32x1xi32> to vector<32x100xi32>
    %3 = arith.cmpi eq, %1, %2 : vector<32x100xi32>
    %4 = arith.extui %3 : vector<32x100xi1> to vector<32x100xi32>
    %5 = arith.sitofp %4 : vector<32x100xi32> to vector<32x100xf32>
    %c0_1 = arith.constant 0 : index
    %c0_2 = arith.constant 0 : index
    %6 = vector.load %arg2[%c0_1, %c0_2] : memref<100x32xf32, #tpu.memory_space<vmem>>, vector<100x32xf32>
    %cst = arith.constant dense<0.000000e+00> : vector<32x32xf32>
    %7 = tpu.matmul %5, %6, %cst {dimension_numbers = #tpu.dot_dimension_numbers<[1], [0], [0], [1], [0, 0, 1, 1], [], []>} : vector<32x100xf32>, vector<100x32xf32>, vector<32x32xf32> -> vector<32x32xf32>
    %c0_3 = arith.constant 0 : index
    %c0_4 = arith.constant 0 : index
    %8 = vector.load %arg12[%c0_3, %c0_4] : memref<35x32xf32, #tpu.memory_space<vmem>>, vector<32x32xf32>
    tpu.vector_store %arg12[%c0_3, %c0_4], %7 {strides = array<i32>} : memref<35x32xf32, #tpu.memory_space<vmem>>, vector<32x32xf32>,
    %cst_5 = arith.constant 0.000000e+00 : f32
    %9 = vector.broadcast %cst_5 : f32 to vector<3x32xf32>
    %c32 = arith.constant 32 : index
    %c0_6 = arith.constant 0 : index
    %10 = vector.load %arg12[%c32, %c0_6] : memref<35x32xf32, #tpu.memory_space<vmem>>, vector<3x32xf32>
    tpu.vector_store %arg12[%c32, %c0_6], %9 {strides = array<i32>} : memref<35x32xf32, #tpu.memory_space<vmem>>, vector<3x32xf32>,
    %c0_7 = arith.constant 0 : index
    %c0_8 = arith.constant 0 : index
    %11 = vector.load %arg12[%c0_7, %c0_8] : memref<35x32xf32, #tpu.memory_space<vmem>>, vector<32x32xf32>
    %12 = arith.truncf %11 : vector<32x32xf32> to vector<32x32xbf16>
    %c1 = arith.constant 1 : index
    %c0_9 = arith.constant 0 : index
    %13 = vector.load %arg12[%c1, %c0_9] : memref<35x32xf32, #tpu.memory_space<vmem>>, vector<32x32xf32>
    %14 = arith.truncf %13 : vector<32x32xf32> to vector<32x32xbf16>
    %c2 = arith.constant 2 : index
    %c0_10 = arith.constant 0 : index
    %15 = vector.load %arg12[%c2, %c0_10] : memref<35x32xf32, #tpu.memory_space<vmem>>, vector<32x32xf32>
    %16 = arith.truncf %15 : vector<32x32xf32> to vector<32x32xbf16>
    %c3 = arith.constant 3 : index
    %c0_11 = arith.constant 0 : index
    %17 = vector.load %arg12[%c3, %c0_11] : memref<35x32xf32, #tpu.memory_space<vmem>>, vector<32x32xf32>
    %18 = arith.truncf %17 : vector<32x32xf32> to vector<32x32xbf16>
    %c0_12 = arith.constant 0 : index
    %c0_13 = arith.constant 0 : index
    %19 = vector.load %arg1[%c0_12, %c0_13] : memref<32x1xi32, #tpu.memory_space<vmem>>, vector<32x1xi32>
    %c0_14 = arith.constant 0 : index
    %c0_15 = arith.constant 0 : index
    %20 = vector.load %arg3[%c0_14, %c0_15] : memref<64x128xbf16, #tpu.memory_space<vmem>>, vector<32x128xbf16>
    %cst_16 = arith.constant dense<0.000000e+00> : vector<32x128xf32>
    %21 = tpu.matmul %12, %20, %cst_16 {dimension_numbers = #tpu.dot_dimension_numbers<[1], [0], [0], [1], [0, 0, 1, 1], [], []>} : vector<32x32xbf16>, vector<32x128xbf16>, vector<32x128xf32> -> vector<32x128xf32>
    %c32_17 = arith.constant 32 : index
    %c0_18 = arith.constant 0 : index
    %22 = vector.load %arg3[%c32_17, %c0_18] : memref<64x128xbf16, #tpu.memory_space<vmem>>, vector<32x128xbf16>
    %cst_19 = arith.constant dense<0.000000e+00> : vector<32x128xf32>
    %23 = tpu.matmul %14, %22, %cst_19 {dimension_numbers = #tpu.dot_dimension_numbers<[1], [0], [0], [1], [0, 0, 1, 1], [], []>} : vector<32x32xbf16>, vector<32x128xbf16>, vector<32x128xf32> -> vector<32x128xf32>
    %24 = arith.addf %21, %23 : vector<32x128xf32>
    %c0_20 = arith.constant 0 : index
    %c0_21 = arith.constant 0 : index
    %25 = vector.load %arg4[%c0_20, %c0_21] : memref<1x128xf32, #tpu.memory_space<vmem>>, vector<1x128xf32>
    %26 = vector.broadcast %25 : vector<1x128xf32> to vector<32x128xf32>
    %27 = arith.addf %24, %26 : vector<32x128xf32>
    %cst_22 = arith.constant 0.000000e+00 : f32
    %28 = vector.broadcast %cst_22 : f32 to vector<32x128xf32>
    %29 = arith.maximumf %27, %28 : vector<32x128xf32>
    %c14_i32 = arith.constant 14 : i32
    %30 = vector.broadcast %c14_i32 : i32 to vector<32x1xi32>
    %31 = arith.cmpi sle, %19, %30 : vector<32x1xi32>
    %cst_23 = arith.constant 0.000000e+00 : f32
    %32 = vector.shape_cast %31 : vector<32x1xi1> to vector<32x1xi1>
    %33 = vector.broadcast %32 : vector<32x1xi1> to vector<32x128xi1>
    %34 = vector.broadcast %cst_23 : f32 to vector<32x128xf32>
    %35 = arith.select %33, %29, %34 : vector<32x128xi1>, vector<32x128xf32>
    %36 = vector.shape_cast %35 : vector<32x128xf32> to vector<2x16x128xf32>
    %cst_24 = arith.constant dense<0xFF800000> : vector<2x128xf32>
    %37 = vector.multi_reduction <maximumf>, %36, %cst_24 [1] : vector<2x16x128xf32> to vector<2x128xf32>
    %c0_25 = arith.constant 0 : index
    %c0_26 = arith.constant 0 : index
    %38 = vector.load %arg5[%c0_25, %c0_26] : memref<96x128xbf16, #tpu.memory_space<vmem>>, vector<32x128xbf16>
    %cst_27 = arith.constant dense<0.000000e+00> : vector<32x128xf32>
    %39 = tpu.matmul %12, %38, %cst_27 {dimension_numbers = #tpu.dot_dimension_numbers<[1], [0], [0], [1], [0, 0, 1, 1], [], []>} : vector<32x32xbf16>, vector<32x128xbf16>, vector<32x128xf32> -> vector<32x128xf32>
    %c32_28 = arith.constant 32 : index
    %c0_29 = arith.constant 0 : index
    %40 = vector.load %arg5[%c32_28, %c0_29] : memref<96x128xbf16, #tpu.memory_space<vmem>>, vector<32x128xbf16>
    %cst_30 = arith.constant dense<0.000000e+00> : vector<32x128xf32>
    %41 = tpu.matmul %14, %40, %cst_30 {dimension_numbers = #tpu.dot_dimension_numbers<[1], [0], [0], [1], [0, 0, 1, 1], [], []>} : vector<32x32xbf16>, vector<32x128xbf16>, vector<32x128xf32> -> vector<32x128xf32>
    %42 = arith.addf %39, %41 : vector<32x128xf32>
    %c64 = arith.constant 64 : index
    %c0_31 = arith.constant 0 : index
    %43 = vector.load %arg5[%c64, %c0_31] : memref<96x128xbf16, #tpu.memory_space<vmem>>, vector<32x128xbf16>
    %cst_32 = arith.constant dense<0.000000e+00> : vector<32x128xf32>
    %44 = tpu.matmul %16, %43, %cst_32 {dimension_numbers = #tpu.dot_dimension_numbers<[1], [0], [0], [1], [0, 0, 1, 1], [], []>} : vector<32x32xbf16>, vector<32x128xbf16>, vector<32x128xf32> -> vector<32x128xf32>
    %45 = arith.addf %42, %44 : vector<32x128xf32>
    %c0_33 = arith.constant 0 : index
    %c0_34 = arith.constant 0 : index
    %46 = vector.load %arg6[%c0_33, %c0_34] : memref<1x128xf32, #tpu.memory_space<vmem>>, vector<1x128xf32>
    %47 = vector.broadcast %46 : vector<1x128xf32> to vector<32x128xf32>
    %48 = arith.addf %45, %47 : vector<32x128xf32>
    %cst_35 = arith.constant 0.000000e+00 : f32
    %49 = vector.broadcast %cst_35 : f32 to vector<32x128xf32>
    %50 = arith.maximumf %48, %49 : vector<32x128xf32>
    %c13_i32 = arith.constant 13 : i32
    %51 = vector.broadcast %c13_i32 : i32 to vector<32x1xi32>
    %52 = arith.cmpi sle, %19, %51 : vector<32x1xi32>
    %cst_36 = arith.constant 0.000000e+00 : f32
    %53 = vector.shape_cast %52 : vector<32x1xi1> to vector<32x1xi1>
    %54 = vector.broadcast %53 : vector<32x1xi1> to vector<32x128xi1>
    %55 = vector.broadcast %cst_36 : f32 to vector<32x128xf32>
    %56 = arith.select %54, %50, %55 : vector<32x128xi1>, vector<32x128xf32>
    %57 = vector.shape_cast %56 : vector<32x128xf32> to vector<2x16x128xf32>
    %cst_37 = arith.constant dense<0xFF800000> : vector<2x128xf32>
    %58 = vector.multi_reduction <maximumf>, %57, %cst_37 [1] : vector<2x16x128xf32> to vector<2x128xf32>
    %c0_38 = arith.constant 0 : index
    %c0_39 = arith.constant 0 : index
    %59 = vector.load %arg7[%c0_38, %c0_39] : memref<128x128xbf16, #tpu.memory_space<vmem>>, vector<32x128xbf16>
    %cst_40 = arith.constant dense<0.000000e+00> : vector<32x128xf32>
    %60 = tpu.matmul %12, %59, %cst_40 {dimension_numbers = #tpu.dot_dimension_numbers<[1], [0], [0], [1], [0, 0, 1, 1], [], []>} : vector<32x32xbf16>, vector<32x128xbf16>, vector<32x128xf32> -> vector<32x128xf32>
    %c32_41 = arith.constant 32 : index
    %c0_42 = arith.constant 0 : index
    %61 = vector.load %arg7[%c32_41, %c0_42] : memref<128x128xbf16, #tpu.memory_space<vmem>>, vector<32x128xbf16>
    %cst_43 = arith.constant dense<0.000000e+00> : vector<32x128xf32>
    %62 = tpu.matmul %14, %61, %cst_43 {dimension_numbers = #tpu.dot_dimension_numbers<[1], [0], [0], [1], [0, 0, 1, 1], [], []>} : vector<32x32xbf16>, vector<32x128xbf16>, vector<32x128xf32> -> vector<32x128xf32>
    %63 = arith.addf %60, %62 : vector<32x128xf32>
    %c64_44 = arith.constant 64 : index
    %c0_45 = arith.constant 0 : index
    %64 = vector.load %arg7[%c64_44, %c0_45] : memref<128x128xbf16, #tpu.memory_space<vmem>>, vector<32x128xbf16>
    %cst_46 = arith.constant dense<0.000000e+00> : vector<32x128xf32>
    %65 = tpu.matmul %16, %64, %cst_46 {dimension_numbers = #tpu.dot_dimension_numbers<[1], [0], [0], [1], [0, 0, 1, 1], [], []>} : vector<32x32xbf16>, vector<32x128xbf16>, vector<32x128xf32> -> vector<32x128xf32>
    %66 = arith.addf %63, %65 : vector<32x128xf32>
    %c96 = arith.constant 96 : index
    %c0_47 = arith.constant 0 : index
    %67 = vector.load %arg7[%c96, %c0_47] : memref<128x128xbf16, #tpu.memory_space<vmem>>, vector<32x128xbf16>
    %cst_48 = arith.constant dense<0.000000e+00> : vector<32x128xf32>
    %68 = tpu.matmul %18, %67, %cst_48 {dimension_numbers = #tpu.dot_dimension_numbers<[1], [0], [0], [1], [0, 0, 1, 1], [], []>} : vector<32x32xbf16>, vector<32x128xbf16>, vector<32x128xf32> -> vector<32x128xf32>
    %69 = arith.addf %66, %68 : vector<32x128xf32>
    %c0_49 = arith.constant 0 : index
    %c0_50 = arith.constant 0 : index
    %70 = vector.load %arg8[%c0_49, %c0_50] : memref<1x128xf32, #tpu.memory_space<vmem>>, vector<1x128xf32>
    %71 = vector.broadcast %70 : vector<1x128xf32> to vector<32x128xf32>
    %72 = arith.addf %69, %71 : vector<32x128xf32>
    %cst_51 = arith.constant 0.000000e+00 : f32
    %73 = vector.broadcast %cst_51 : f32 to vector<32x128xf32>
    %74 = arith.maximumf %72, %73 : vector<32x128xf32>
    %c12_i32 = arith.constant 12 : i32
    %75 = vector.broadcast %c12_i32 : i32 to vector<32x1xi32>
    %76 = arith.cmpi sle, %19, %75 : vector<32x1xi32>
    %cst_52 = arith.constant 0.000000e+00 : f32
    %77 = vector.shape_cast %76 : vector<32x1xi1> to vector<32x1xi1>
    %78 = vector.broadcast %77 : vector<32x1xi1> to vector<32x128xi1>
    %79 = vector.broadcast %cst_52 : f32 to vector<32x128xf32>
    %80 = arith.select %78, %74, %79 : vector<32x128xi1>, vector<32x128xf32>
    %81 = vector.shape_cast %80 : vector<32x128xf32> to vector<2x16x128xf32>
    %cst_53 = arith.constant dense<0xFF800000> : vector<2x128xf32>
    %82 = vector.multi_reduction <maximumf>, %81, %cst_53 [1] : vector<2x16x128xf32> to vector<2x128xf32>
    %83 = tpu.concatenate %37, %58, %82 in 1 : vector<2x128xf32>, vector<2x128xf32>, vector<2x128xf32> -> vector<2x384xf32>
    %84 = arith.truncf %83 : vector<2x384xf32> to vector<2x384xbf16>
    %c0_54 = arith.constant 0 : index
    %c0_55 = arith.constant 0 : index
    %85 = vector.load %arg9[%c0_54, %c0_55] : memref<384x128xbf16, #tpu.memory_space<vmem>>, vector<384x128xbf16>
    %cst_56 = arith.constant dense<0.000000e+00> : vector<2x128xf32>
    %86 = tpu.matmul %84, %85, %cst_56 {dimension_numbers = #tpu.dot_dimension_numbers<[1], [0], [0], [1], [0, 0, 1, 1], [], []>} : vector<2x384xbf16>, vector<384x128xbf16>, vector<2x128xf32> -> vector<2x128xf32>
    %c0_57 = arith.constant 0 : index
    %c0_58 = arith.constant 0 : index
    %87 = vector.load %arg10[%c0_57, %c0_58] : memref<1x128xf32, #tpu.memory_space<vmem>>, vector<1x128xf32>
    %88 = vector.broadcast %87 : vector<1x128xf32> to vector<2x128xf32>
    %89 = arith.addf %86, %88 : vector<2x128xf32>
    %c0_59 = arith.constant 0 : index
    %c0_60 = arith.constant 0 : index
    %90 = vector.load %arg11[%c0_59, %c0_60] : memref<2x128xf32, #tpu.memory_space<vmem>>, vector<2x128xf32>
    tpu.vector_store %arg11[%c0_59, %c0_60], %89 {strides = array<i32>} : memref<2x128xf32, #tpu.memory_space<vmem>>, vector<2x128xf32>,
    return
  }
}

</mosaic_0001>

<bundles_post_ra>
// kernel: textcnn_forward.1
= control target key start
LH: loop header
LB: loop body
LE: loop exit
PB: predicated region body
PF: predicated region fallthrough
CT: control target
= control target key end

     0   :  { %16 = vsyncpa [#allocation4], 0  ;;  %s1602_s0 = inlined_call_operand.vmem [shape: s32[32,1], index: 0, kind: input, shape index: {}]   ;;  %s1603_s1 = inlined_call_operand.vmem [shape: s32[32,1], index: 1, kind: input, shape index: {}]   ;;  %s1604_s2 = inlined_call_operand.hbm [shape: f32[100,32], index: 2, kind: input, shape index: {}]   ;;  %s1605_s3 = inlined_call_operand.hbm [shape: bf16[64,128], index: 3, kind: input, shape index: {}]   ;;  %s1606_s4 = inlined_call_operand.vmem [shape: f32[1,128], index: 4, kind: input, shape index: {}]   ;;  %s1607_s5 = inlined_call_operand.hbm [shape: bf16[96,128], index: 5, kind: input, shape index: {}]   ;;  %s1608_s6 = inlined_call_operand.vmem [shape: f32[1,128], index: 6, kind: input, shape index: {}]   ;;  %s1609_s7 = inlined_call_operand.vmem [shape: bf16[128,128], index: 7, kind: input, shape index: {}]   ;;  %s1610_s8 = inlined_call_operand.vmem [shape: f32[1,128], index: 8, kind: input, shape index: {}]   ;;  %s1611_s9 = inlined_call_operand.hbm [shape: bf16[384,128], index: 9, kind: input, shape index: {}]   ;;  %s1612_s10 = inlined_call_operand.vmem [shape: f32[1,128], index: 10, kind: input, shape index: {}]   ;;  %s1613_s11 = inlined_call_operand.hbm [shape: f32[2,128], index: 11, kind: output, shape index: {}]  }
   0x1   :  { %17 = vsyncpa [#allocation7], 0 }
   0x2   :  { %18 = vsyncpa [#allocation10], 0  ;;  %s41_s19 = sshll.u32 %s1605_s3, 4  ;;  %s42_s19 = int_to_ptr.hbm [resolvable:$true] %s41_s19 }
   0x3   :  { %19 = vsyncpa [#allocation5], 0  ;;  %s1396_s20 = smov [#allocation6]   ;;  %s28_s24 = sshll.u32 %s1604_s2, 4  ;;  %s29_s24 = int_to_ptr.hbm [resolvable:$true] %s28_s24 }
   0x4   :  { %s43_s21 = sshll.u32 %s1396_s20, 4  ;;  %s1397_s25 = smov 64   ;;  %s44_s21 = int_to_ptr.vmem [resolvable:$true] %s43_s21 }
   0x5   :  { %s1398_s26 = smov 4   ;;  %s1399_s27 = smov [#allocation3]  }
   0x6   :  { %49 = dma.hbm_to_vmem [thread:$0]  %s42_s19, 512, %s44_s21, [#allocation7], %s1397_s25, %s1397_s25, %s1398_s26  }
   0x7   :  { %s30_s28 = sshll.u32 %s1399_s27, 4  ;;  %s1400_s29 = smov 128   ;;  %s31_s28 = int_to_ptr.vmem [resolvable:$true] %s30_s28 }
   0x8   :  { %s1401_s30 = smov 8   ;;  %s56_s13 = sshll.u32 %s1607_s5, 4  ;;  %s57_s13 = int_to_ptr.hbm [resolvable:$true] %s56_s13 }
   0x9   :  { %36 = dma.hbm_to_vmem [thread:$0]  %s29_s24, 1664, %s31_s28, [#allocation4], %s1400_s29, %s1400_s29, %s1401_s30  }
   0xa   :  { %s1402_s14 = smov [#allocation8]   ;;  %s75_s17 = sshll.u32 %s1611_s9, 4  ;;  %s76_s17 = int_to_ptr.hbm [resolvable:$true] %s75_s17 }
   0xb   :  { %s58_s15 = sshll.u32 %s1402_s14, 4  ;;  %s1403_s18 = smov [#allocation9]   ;;  %s59_s15 = int_to_ptr.vmem [resolvable:$true] %s58_s15 }
   0xc   :  { %64 = dma.hbm_to_vmem [thread:$0]  %s57_s13, 768, %s59_s15, [#allocation7], %s1397_s25, %s1397_s25, %s1398_s26  }
   0xd   :  { %s77_s19 = sshll.u32 %s1403_s18, 4  ;;  %s78_s19 = int_to_ptr.vmem [resolvable:$true] %s77_s19 }
   0xe   :  { %83 = dma.hbm_to_vmem [thread:$0]  %s76_s17, 3072, %s78_s19, [#allocation10], %s1397_s25, %s1397_s25, %s1398_s26  }
   0xf   :  { %1388 = dma.done.wait [#allocation4], 1664  }
  0x10   :  { %1389 = vsyncadd [#allocation4], 4294965632 }
  0x11   :  { %1390 = dma.done.wait [#allocation7], 1280  }
  0x12   :  { %1391 = vsyncadd [#allocation7], 4294966016 }
  0x13   :  { %1392 = dma.done.wait [#allocation10], 3072  }
  0x14   :  { %1393 = vsyncadd [#allocation10], 4294964224  ;;  %v1404_v0 = vmov 0   ;;  %v105_v1 = vld [vmem:[%s1602_s0 + $0x10] sm:$0xff]  ;;  %v103_v2 = vld [vmem:[%s1602_s0] sm:$0xff]  ;;  %vm159_vm0 = vcmask 1043456   ;;  %v107_v30 = vlaneseq }
  0x15   :  { %1262 = vset.pattern.permute.xlu1 %v1404_v0  ;;  %1261 = vset.pattern.permute.xlu0 %v1404_v0  ;;  %v106_v3 = vld [vmem:[%s1602_s0 + $0x18] sm:$0xff]  ;;  %v104_v4 = vld [vmem:[%s1602_s0 + $0x8] sm:$0xff]  ;;  %v1502_v6 = vld [vmem:[%s1603_s1 + $0x10] sm:$0xff]  ;;  %vm197_vm1 = vcmask 256000   ;;  %v1405_v10 = vmov 0.0   ;;  %vm146_vm9 = vcmask 818176  }
  0x16   :  { %1263 = vset.pattern.permute.xlu2 %v1404_v0  ;;  %116 = vperm.xlu1 %1262, %v105_v1   ;;  %v1497_v5 = vld [vmem:[%s1603_s1 + $0x18] sm:$0xff]  ;;  %v145_v7 = vld [vmem:[#allocation3 + $0x60] sm:$0xf]  ;;  %v144_v8 = vld [vmem:[#allocation3 + $0x58] sm:$0xff]  ;;  %vm323_vm3 = vcmp.le.s32.totalorder %v1502_v6, 14  ;;  %vm492_vm4 = vcmp.le.s32.totalorder %v1502_v6, 13 }
  0x17   :  { %110 = vperm.xlu0 %1261, %v103_v2   ;;  %1015 = vmatpush.msk.msra.mxu0 %vm159_vm0, %v145_v7  ;;  %vm324_vm2 = vcmp.le.s32.totalorder %v1497_v5, 14  ;;  %v143_v9 = vld [vmem:[#allocation3 + $0x50] sm:$0xff]  ;;  %198 = vst.msk [vmem:[#allocation2 + $0x20] sm:$0x7] %vm197_vm1, %v1405_v10  ;;  %v142_v11 = vld [vmem:[#allocation3 + $0x48] sm:$0xff]  ;;  %v327_v13 = vsel %vm323_vm3, 1, %v1404_v0 }
  0x18   :  { %v328_v12 = vsel %vm324_vm2, 1, %v1404_v0  ;;  %v141_v14 = vld [vmem:[#allocation3 + $0x40] sm:$0xff]  ;;  %v140_v16 = vld [vmem:[#allocation3 + $0x38] sm:$0xff]  ;;  %v139_v17 = vld [vmem:[#allocation3 + $0x30] sm:$0xff]  ;;  %v496_v19 = vsel %vm492_vm4, 1, %v1404_v0  ;;  %vm701_vm8 = vcmp.le.s32.totalorder %v1497_v5, 12 }
  0x19   :  { %167 = vmatpush.msra.mxu0 %v144_v8  ;;  %v1511_v15 = vld [vmem:[%s1603_s1 + $0x8] sm:$0xff]  ;;  %v138_v18 = vld [vmem:[#allocation3 + $0x28] sm:$0xff]  ;;  %v1520_v22 = vld [vmem:[%s1603_s1] sm:$0xff]  ;;  %v705_v28 = vsel %vm701_vm8, 1, %v1404_v0  ;;  %v108_v31 = vand.u32 127, %v107_v30  ;;  %vm192_vm14 = vcmask 261120  }
  0x1a   :  { %vm491_vm5 = vcmp.le.s32.totalorder %v1511_v15, 13  ;;  %v137_v21 = vld [vmem:[#allocation3 + $0x20] sm:$0xff]  ;;  %v136_v23 = vld [vmem:[#allocation3 + $0x18] sm:$0xff]  ;;  %vm699_vm6 = vcmp.le.s32.totalorder %v1511_v15, 12  ;;  %vm698_vm7 = vcmp.le.s32.totalorder %v1520_v22, 12  ;;  %v135_v24 = vld [vmem:[#allocation3 + $0x10] sm:$0xff] }
  0x1b   :  { %168 = vmatpush.msra.mxu0 %v143_v9  ;;  %v495_v20 = vsel %vm491_vm5, 1, %v1404_v0  ;;  %v134_v25 = vld [vmem:[#allocation3 + $0x8] sm:$0xff]  ;;  %v703_v26 = vsel %vm699_vm6, 1, %v1404_v0  ;;  %v702_v27 = vsel %vm698_vm7, 1, %v1404_v0  ;;  %v133_v29 = vld [vmem:[#allocation3] sm:$0xff]  ;;  %v1207_v40 = vld [vmem:[#allocation6 + $0x8] sm:$0xff] }
  0x1c   :  { %v1217_v41 = vld [vmem:[%s1609_s7 + $0x8] sm:$0xff]  ;;  %296 = vmatpush.bf16.msra.mxu2 %v1207_v40  ;;  %v1206_v42 = vld [vmem:[#allocation6] sm:$0xff]  ;;  %v1216_v43 = vld [vmem:[%s1609_s7] sm:$0xff]  ;;  %vm321_vm15 = vcmp.le.s32.totalorder %v1520_v22, 14  ;;  %vm322_vm0 = vcmp.le.s32.totalorder %v1511_v15, 14  ;;  %vm490_vm1 = vcmp.le.s32.totalorder %v1520_v22, 13 }
  0x1d   :  { %169 = vmatpush.msra.mxu0 %v142_v11  ;;  %v1209_v44 = vld [vmem:[#allocation6 + $0x18] sm:$0xff]  ;;  %v1215_v45 = vld [vmem:[#allocation8 + $0x28] sm:$0xff]  ;;  %v1208_v46 = vld [vmem:[#allocation6 + $0x10] sm:$0xff]  ;;  %v325_v1 = vsel %vm321_vm15, 1, %v1404_v0  ;;  %v494_v15 = vsel %vm490_vm1, 1, %v1404_v0  ;;  %vm493_vm2 = vcmp.le.s32.totalorder %v1497_v5, 13 }
  0x1e   :  { %119 = vperm.xlu1 %1262, %v106_v3   ;;  %259 = vmatpush.bf16.msra.mxu1 %v1209_v44  ;;  %v1213_v48 = vld [vmem:[#allocation8 + $0x18] sm:$0xff]  ;;  %v1211_v49 = vld [vmem:[#allocation8 + $0x8] sm:$0xff]  ;;  %v1214_v50 = vld [vmem:[#allocation8 + $0x20] sm:$0xff]  ;;  %vm700_vm3 = vcmp.le.s32.totalorder %v1502_v6, 12  ;;  %vm742_vm8 = vcmask 1041409   ;;  %s1406_s29 = smov [#allocation11]  }
  0x1f   :  { %113 = vperm.xlu0 %1261, %v104_v4   ;;  %170 = vmatpush.msra.mxu0 %v141_v14  ;;  %v1210_v51 = vld [vmem:[#allocation8] sm:$0xff]  ;;  %v1212_v52 = vld [vmem:[#allocation8 + $0x10] sm:$0xff]  ;;  %v1223_v58 = vld [vmem:[%s1609_s7 + $0x38] sm:$0xff]  ;;  %v326_v14 = vsel %vm322_vm0, 1, %v1404_v0  ;;  %s997_s0 = sshll.u32 %s1406_s29, 4  ;;  %s999_s12 = sshll.u32 %s1613_s11, 4  ;;  %s998_s0 = int_to_ptr.vmem [resolvable:$true] %s997_s0  ;;  %s1000_s12 = int_to_ptr.hbm [resolvable:$true] %s999_s12 }
  0x20   :  { %297 = vmatpush.bf16.msra.mxu2 %v1206_v42  ;;  %1248 = vmatpush.bf16.msra.mxu3 %v1209_v44  ;;  %v1221_v63 = vld [vmem:[%s1609_s7 + $0x28] sm:$0xff]  ;;  %v1219_v3 = vld [vmem:[%s1609_s7 + $0x18] sm:$0xff]  ;;  %v1222_v11 = vld [vmem:[%s1609_s7 + $0x30] sm:$0xff] }
  0x21   :  { %171 = vmatpush.msra.mxu0 %v140_v16  ;;  %330 = vperm.xlu2 %1263, %v325_v1   ;;  %v1230_v6 = vld [vmem:[#allocation9 + $0x30] sm:$0xff]  ;;  %v1228_v30 = vld [vmem:[#allocation9 + $0x20] sm:$0xff]  ;;  %v1225_v40 = vld [vmem:[#allocation9 + $0x8] sm:$0xff] }
  0x22   :  { %260 = vmatpush.bf16.msra.mxu1 %v1208_v46 }
  0x23   :  { %172 = vmatpush.msra.mxu0 %v139_v17 }
  0x24   :  { %461 = vmatpush.bf16.msrb.mxu2 %v1215_v45  ;;  %1249 = vmatpush.bf16.msra.mxu3 %v1208_v46  ;;  %v1224_v45 = vld [vmem:[#allocation9] sm:$0xff] }
  0x25   :  { %173 = vmatpush.msra.mxu0 %v138_v18 }
  0x26   :  { %339 = vperm.xlu1 %1262, %v328_v12   ;;  %420 = vmatpush.bf16.msrb.mxu1 %v1211_v49  ;;  %v1220_v12 = vld [vmem:[%s1609_s7 + $0x20] sm:$0xff] }
  0x27   :  { %336 = vperm.xlu0 %1261, %v327_v13   ;;  %174 = vmatpush.msra.mxu0 %v137_v21  ;;  %v1218_v13 = vld [vmem:[%s1609_s7 + $0x10] sm:$0xff] }
  0x28   :  { %389 = vmatpush.bf16.msrb.mxu3 %v1213_v48  ;;  %462 = vmatpush.bf16.msrb.mxu2 %v1214_v50 }
  0x29   :  { %175 = vmatpush.msra.mxu0 %v136_v23  ;;  %333 = vperm.xlu2 %1263, %v326_v14   ;;  %v497_v23 = vsel %vm493_vm2, 1, %v1404_v0 }
  0x2a   :  { %421 = vmatpush.bf16.msrb.mxu1 %v1210_v51 }
  0x2b   :  { %176 = vmatpush.msra.mxu0 %v135_v24  ;;  %v704_v24 = vsel %vm700_vm3, 1, %v1404_v0  ;;  %v1231_v0 = vld [vmem:[#allocation9 + $0x38] sm:$0xff] }
  0x2c   :  { %390 = vmatpush.bf16.msrb.mxu3 %v1212_v52 }
  0x2d   :  { %177 = vmatpush.msra.mxu0 %v134_v25 }
  0x2e   :  { %505 = vperm.xlu1 %1262, %v496_v19  }
  0x2f   :  { %502 = vperm.xlu0 %1261, %v495_v20   ;;  %178 = vmatpush.msra.mxu0 %v133_v29  ;;  %v1229_v29 = vld [vmem:[#allocation9 + $0x28] sm:$0xff] }
  0x31   :  { %589 = vmatpush.bf16.msrb.mxu0 %v1217_v41  ;;  %499 = vperm.xlu2 %1263, %v494_v15  }
  0x35   :  { %590 = vmatpush.bf16.msrb.mxu0 %v1216_v43 }
  0x36   :  { %710 = vperm.xlu1 %1262, %v703_v26  }
  0x37   :  { %707 = vperm.xlu0 %1261, %v702_v27  }
  0x39   :  { %508 = vperm.xlu2 %1263, %v497_v23  }
  0x3f   :  { %716 = vperm.xlu0 %1261, %v705_v28  }
  0x41   :  { %713 = vperm.xlu2 %1263, %v704_v24  }
  0x88   :  { %v117_v36 = vpop.permute.xlu1 %116 }
  0x89   :  { %v111_v32 = vpop.permute.xlu0 %110  ;;  %vm123_vm12 = vcmp.eq.s32.totalorder %v108_v31, %v117_v36 }
  0x8a   :  { %vm121_vm10 = vcmp.eq.s32.totalorder %v108_v31, %v111_v32  ;;  %v1013_v37 = vsel %vm123_vm12, 1.0, %v1405_v10  ;;  %v331_v32 = vpop.permute.xlu2 %330 }
  0x8b   :  { %v1011_v33 = vsel %vm121_vm10, 1.0, %v1405_v10  ;;  %vm341_vm5 = vcmp.eq.s32.totalorder %v331_v32, 1  ;;  %v1233_v32 = vld [vmem:[#allocation9 + $0x48] sm:$0xff] }
  0x8c   :  { %1016 = vmatmul.msk.f32.vlgmr.msra.gmra.mxu0 %vm146_vm9, %v1011_v33 }
  0x90   :  { %v120_v38 = vpop.permute.xlu1 %119 }
  0x91   :  { %v114_v34 = vpop.permute.xlu0 %113  ;;  %vm124_vm13 = vcmp.eq.s32.totalorder %v108_v31, %v120_v38 }
  0x92   :  { %vm122_vm11 = vcmp.eq.s32.totalorder %v108_v31, %v114_v34  ;;  %v1014_v39 = vsel %vm124_vm13, 1.0, %v1405_v10  ;;  %v1227_v34 = vld [vmem:[#allocation9 + $0x18] sm:$0xff]  ;;  %v334_v43 = vpop.permute.xlu2 %333 }
  0x93   :  { %v1012_v35 = vsel %vm122_vm11, 1.0, %v1405_v10  ;;  %vm342_vm4 = vcmp.eq.s32.totalorder %v334_v43, 1 }
  0x94   :  { %1017 = vmatmul.msk.f32.gmra.mxu0 %vm146_vm9, %v1012_v35  ;;  %v1226_v35 = vld [vmem:[#allocation9 + $0x10] sm:$0xff] }
  0x9c   :  { %1018 = vmatmul.msk.f32.gmra.mxu0 %vm146_vm9, %v1013_v37  ;;  %v1264_v37 = vld [vmem:[%s1606_s4] ss:$0 sm:$0xff] }
  0xa4   :  { %1019 = vmatmul.msk.f32.gmra.mxu0 %vm146_vm9, %v1014_v39 }
 0x109   :  { %v180_v47 = vpop.f32.mrf.mxu0 }
 0x10a   :  { %193 = vst.msk [vmem:[#allocation2] sm:$0xff] %vm192_vm14, %v180_v47 }
 0x111   :  { %v183_v53 = vpop.f32.mrf.mxu0  ;;  %v199_v55 = vld [vmem:[#allocation2] sm:$0xff] }
 0x112   :  { %194 = vst.msk [vmem:[#allocation2 + $0x8] sm:$0xff] %vm192_vm14, %v183_v53 }
 0x119   :  { %v186_v54 = vpop.f32.mrf.mxu0  ;;  %v200_v56 = vld [vmem:[#allocation2 + $0x8] sm:$0xff] }
 0x11a   :  { %195 = vst.msk [vmem:[#allocation2 + $0x10] sm:$0xff] %vm192_vm14, %v186_v54  ;;  %v203_v57 = vpack.c.bf16 %v200_v56, %v199_v55  ;;  %v205_v60 = vld [vmem:[#allocation2 + $0x1] sm:$0xff]  ;;  %v1239_v55 = vld [vmem:[#allocation9 + $0x78] sm:$0xff] }
 0x11b   :  { %v211_v17 = vld [vmem:[#allocation2 + $0x2] sm:$0xff]  ;;  %965 = vmatpush.bf16.msra.mxu0 %v1239_v55 }
 0x11c   :  { %1038 = vmatmul.msk.bf16.vlgmr.msra.gmra.mxu2 %vm192_vm14, %v203_v57  ;;  %1088 = vmatmul.msk.bf16.vlgmr.msrb.gmra.mxu0 %vm192_vm14, %v203_v57  ;;  %v217_v25 = vld [vmem:[#allocation2 + $0x3] sm:$0xff] }
 0x11d   :  { %669 = vmatpush.bf16.msra.mxu2 %v1223_v58 }
 0x121   :  { %v189_v59 = vpop.f32.mrf.mxu0  ;;  %v206_v61 = vld [vmem:[#allocation2 + $0x9] sm:$0xff]  ;;  %670 = vmatpush.bf16.msra.mxu2 %v1222_v11 }
 0x122   :  { %196 = vst.msk [vmem:[#allocation2 + $0x18] sm:$0xff] %vm192_vm14, %v189_v59  ;;  %v209_v62 = vpack.c.bf16 %v206_v61, %v205_v60  ;;  %v201_v2 = vld [vmem:[#allocation2 + $0x10] sm:$0xff] }
 0x123   :  { %v212_v16 = vld [vmem:[#allocation2 + $0xa] sm:$0xff] }
 0x124   :  { %1028 = vmatmul.msk.bf16.vlgmr.msra.gmra.mxu1 %vm192_vm14, %v209_v62  ;;  %v215_v18 = vpack.c.bf16 %v212_v16, %v211_v17  ;;  %v218_v22 = vld [vmem:[#allocation2 + $0xb] sm:$0xff]  ;;  %v1236_v16 = vld [vmem:[#allocation9 + $0x60] sm:$0xff] }
 0x125   :  { %624 = vmatpush.bf16.msra.mxu1 %v1221_v63  ;;  %v221_v26 = vpack.c.bf16 %v218_v22, %v217_v25  ;;  %v1238_v60 = vld [vmem:[#allocation9 + $0x70] sm:$0xff]  ;;  %v337_v63 = vpop.permute.xlu0 %336 }
 0x126   :  { %966 = vmatpush.bf16.msra.mxu0 %v1238_v60  ;;  %vm343_vm7 = vcmp.eq.s32.totalorder %v337_v63, 1 }
 0x129   :  { %v207_v4 = vld [vmem:[#allocation2 + $0x11] sm:$0xff]  ;;  %v208_v7 = vld [vmem:[#allocation2 + $0x19] sm:$0xff]  ;;  %625 = vmatpush.bf16.msra.mxu1 %v1220_v12 }
 0x12a   :  { %v202_v8 = vld [vmem:[#allocation2 + $0x18] sm:$0xff]  ;;  %v210_v9 = vpack.c.bf16 %v208_v7, %v207_v4  ;;  %v1237_v4 = vld [vmem:[#allocation9 + $0x68] sm:$0xff] }
 0x12b   :  { %v204_v10 = vpack.c.bf16 %v202_v8, %v201_v2  ;;  %v213_v19 = vld [vmem:[#allocation2 + $0x12] sm:$0xff]  ;;  %v214_v20 = vld [vmem:[#allocation2 + $0x1a] sm:$0xff]  ;;  %967 = vmatpush.bf16.msra.mxu0 %v1237_v4 }
 0x12c   :  { %1029 = vmatmul.msk.bf16.vlgmr.msra.gmra.mxu3 %vm192_vm14, %v210_v9  ;;  %v216_v21 = vpack.c.bf16 %v214_v20, %v213_v19  ;;  %v219_v5 = vld [vmem:[#allocation2 + $0x13] sm:$0xff]  ;;  %v220_v27 = vld [vmem:[#allocation2 + $0x1b] sm:$0xff] }
 0x12d   :  { %1039 = vmatmul.msk.bf16.gmra.mxu2 %vm192_vm14, %v204_v10  ;;  %1089 = vmatmul.msk.bf16.gmra.mxu0 %vm192_vm14, %v204_v10  ;;  %v222_v28 = vpack.c.bf16 %v220_v27, %v219_v5  ;;  %v1235_v19 = vld [vmem:[#allocation9 + $0x58] sm:$0xff]  ;;  %v1234_v5 = vld [vmem:[#allocation9 + $0x50] sm:$0xff] }
 0x12e   :  { %558 = vmatpush.bf16.msra.mxu3 %v1219_v3 }
 0x12f   :  { %968 = vmatpush.bf16.msra.mxu0 %v1236_v16 }
 0x132   :  { %559 = vmatpush.bf16.msra.mxu3 %v1218_v13 }
 0x133   :  { %969 = vmatpush.bf16.msra.mxu0 %v1235_v19  ;;  %v1243_v19 = vld [vmem:[#allocation9 + $0x98] sm:$0xff] }
 0x134   :  { %1058 = vmatmul.msk.bf16.vlgmr.msrb.gmra.mxu1 %vm192_vm14, %v203_v57 }
 0x137   :  { %970 = vmatpush.bf16.msra.mxu0 %v1234_v5  ;;  %v1242_v5 = vld [vmem:[#allocation9 + $0x90] sm:$0xff] }
 0x13b   :  { %971 = vmatpush.bf16.msra.mxu0 %v1233_v32 }
 0x13c   :  { %1048 = vmatmul.msk.bf16.vlgmr.msrb.gmra.mxu3 %vm192_vm14, %v209_v62 }
 0x13d   :  { %1068 = vmatmul.msk.bf16.vlgmr.msrb.gmra.mxu2 %vm192_vm14, %v215_v18  ;;  %952 = vmatpush.bf16.msrb.mxu3 %v1231_v0 }
 0x141   :  { %953 = vmatpush.bf16.msrb.mxu3 %v1230_v6 }
 0x144   :  { %1059 = vmatmul.msk.bf16.gmra.mxu1 %vm192_vm14, %v204_v10 }
 0x145   :  { %954 = vmatpush.bf16.msrb.mxu3 %v1229_v29 }
 0x149   :  { %955 = vmatpush.bf16.msrb.mxu3 %v1228_v30 }
 0x14c   :  { %1049 = vmatmul.msk.bf16.gmra.mxu3 %vm192_vm14, %v210_v9 }
 0x14d   :  { %1069 = vmatmul.msk.bf16.gmra.mxu2 %vm192_vm14, %v216_v21  ;;  %956 = vmatpush.bf16.msrb.mxu3 %v1227_v34 }
 0x151   :  { %957 = vmatpush.bf16.msrb.mxu3 %v1226_v35 }
 0x154   :  { %1098 = vmatmul.msk.bf16.vlgmr.msra.gmra.mxu1 %vm192_vm14, %v215_v18 }
 0x155   :  { %958 = vmatpush.bf16.msrb.mxu3 %v1225_v40 }
 0x159   :  { %959 = vmatpush.bf16.msrb.mxu3 %v1224_v45 }
 0x15c   :  { %1078 = vmatmul.msk.bf16.vlgmr.msra.gmra.mxu3 %vm192_vm14, %v209_v62  ;;  %v340_v62 = vpop.permute.xlu1 %339 }
 0x15d   :  { %1108 = vmatmul.msk.bf16.vlgmr.msra.gmra.mxu2 %vm192_vm14, %v221_v26  ;;  %vm344_vm6 = vcmp.eq.s32.totalorder %v340_v62, 1 }
 0x164   :  { %1099 = vmatmul.msk.bf16.gmra.mxu1 %vm192_vm14, %v216_v21  ;;  %v506_v60 = vpop.permute.xlu1 %505 }
 0x165   :  { %vm512_vm12 = vcmp.eq.s32.totalorder %v506_v60, 1 }
 0x16c   :  { %1079 = vmatmul.msk.bf16.gmra.mxu3 %vm192_vm14, %v210_v9 }
 0x16d   :  { %1109 = vmatmul.msk.bf16.gmra.mxu2 %vm192_vm14, %v222_v28  ;;  %v1265_v28 = vld [vmem:[%s1608_s6] ss:$0 sm:$0xff] }
 0x199   :  { %v592_v55 = vpop.f32.mrf.mxu0 }
 0x19f   :  { %v299_v31 = vpop.f32.mrf.mxu2 }
 0x1a1   :  { %v262_v33 = vpop.f32.mrf.mxu1 }
 0x1a2   :  { %v300_v36 = vadd.f32 %v299_v31, %v262_v33 }
 0x1a4   :  { %v313_v41 = vadd.f32 %v1264_v37, %v300_v36  ;;  %v503_v36 = vpop.permute.xlu0 %502 }
 0x1a5   :  { %vm511_vm9 = vcmp.eq.s32.totalorder %v503_v36, 1 }
 0x1a6   :  { %v317_v46 = vmax.f32 %v313_v41, 0.0 }
 0x1a7   :  { %v301_v38 = vpop.f32.mrf.mxu2 }
 0x1a8   :  { %v345_v51 = vsel %vm341_vm5, %v317_v46, 0.0 }
 0x1a9   :  { %v264_v39 = vpop.f32.mrf.mxu1 }
 0x1aa   :  { %v302_v42 = vadd.f32 %v301_v38, %v264_v39 }
 0x1ac   :  { %v314_v44 = vadd.f32 %v1264_v37, %v302_v42  ;;  %v1232_v42 = vld [vmem:[#allocation9 + $0x40] sm:$0xff] }
 0x1ad   :  { %972 = vmatpush.bf16.msra.mxu0 %v1232_v42 }
 0x1ae   :  { %v318_v47 = vmax.f32 %v314_v44, 0.0 }
 0x1af   :  { %v267_v48 = vpop.f32.mrf.mxu3 }
 0x1b0   :  { %v304_v49 = vpop.f32.mrf.mxu2  ;;  %v346_v50 = vsel %vm342_vm4, %v318_v47, 0.0 }
 0x1b1   :  { %v305_v52 = vadd.f32 %v304_v49, %v267_v48  ;;  %v423_v53 = vpop.f32.mrf.mxu1  ;;  %v349_v54 = vmax.f32 %v345_v51, %v346_v50  ;;  %v1247_v50 = vld [vmem:[#allocation9 + $0xb8] sm:$0xff] }
 0x1b2   :  { %978 = vmatpush.bf16.msrb.mxu1 %v1247_v50 }
 0x1b3   :  { %v315_v56 = vadd.f32 %v1264_v37, %v305_v52  ;;  %v350_v57 = vrot.slane %v349_v54, 4 }
 0x1b5   :  { %v319_v1 = vmax.f32 %v315_v56, 0.0  ;;  %v351_v3 = vmax.f32 %v349_v54, %v350_v57  ;;  %v1246_v57 = vld [vmem:[#allocation9 + $0xb0] sm:$0xff] }
 0x1b6   :  { %979 = vmatpush.bf16.msrb.mxu1 %v1246_v57 }
 0x1b7   :  { %v269_v58 = vpop.f32.mrf.mxu3  ;;  %v347_v9 = vsel %vm343_vm7, %v319_v1, 0.0  ;;  %v352_v11 = vrot.slane %v351_v3, 2 }
 0x1b8   :  { %v306_v59 = vpop.f32.mrf.mxu2 }
 0x1b9   :  { %v307_v61 = vadd.f32 %v306_v59, %v269_v58  ;;  %v425_v8 = vpop.f32.mrf.mxu1  ;;  %v353_v18 = vmax.f32 %v351_v3, %v352_v11 }
 0x1bb   :  { %v316_v2 = vadd.f32 %v1264_v37, %v307_v61  ;;  %v354_v24 = vrot.slane %v353_v18, 1  ;;  %v500_v37 = vpop.permute.xlu2 %499 }
 0x1bc   :  { %vm510_vm10 = vcmp.eq.s32.totalorder %v500_v37, 1 }
 0x1bd   :  { %v320_v7 = vmax.f32 %v316_v2, 0.0  ;;  %v355_v30 = vmax.f32 %v353_v18, %v354_v24  ;;  %v1245_v2 = vld [vmem:[#allocation9 + $0xa8] sm:$0xff] }
 0x1be   :  { %980 = vmatpush.bf16.msrb.mxu1 %v1245_v2 }
 0x1bf   :  { %v348_v10 = vsel %vm344_vm6, %v320_v7, 0.0  ;;  %v392_v13 = vpop.f32.mrf.mxu3 }
 0x1c0   :  { %v356_v12 = vmax.f32 %v347_v9, %v348_v10  ;;  %v464_v14 = vpop.f32.mrf.mxu2  ;;  %v424_v20 = vadd.f32 %v423_v53, %v392_v13 }
 0x1c1   :  { %v428_v23 = vpop.f32.mrf.mxu1 }
 0x1c2   :  { %v357_v17 = vrot.slane %v356_v12, 4  ;;  %v474_v27 = vadd.f32 %v464_v14, %v424_v20  ;;  %v594_v14 = vpop.f32.mrf.mxu0 }
 0x1c3   :  { %v509_v63 = vpop.permute.xlu2 %508 }
 0x1c4   :  { %v358_v15 = vmax.f32 %v356_v12, %v357_v17  ;;  %v482_v33 = vadd.f32 %v1265_v28, %v474_v27  ;;  %vm513_vm11 = vcmp.eq.s32.totalorder %v509_v63, 1  ;;  %v1244_v12 = vld [vmem:[#allocation9 + $0xa0] sm:$0xff] }
 0x1c5   :  { %981 = vmatpush.bf16.msrb.mxu1 %v1244_v12 }
 0x1c6   :  { %v359_v21 = vrot.slane %v358_v15, 2  ;;  %v486_v43 = vmax.f32 %v482_v33, 0.0  ;;  %v1241_v33 = vld [vmem:[#allocation9 + $0x88] sm:$0xff] }
 0x1c7   :  { %v394_v25 = vpop.f32.mrf.mxu3 }
 0x1c8   :  { %v360_v22 = vmax.f32 %v358_v15, %v359_v21  ;;  %v466_v26 = vpop.f32.mrf.mxu2  ;;  %v426_v0 = vadd.f32 %v425_v8, %v394_v25  ;;  %v514_v47 = vsel %vm510_vm10, %v486_v43, 0.0 }
 0x1c9   :  { %v430_v45 = vpop.f32.mrf.mxu1  ;;  %982 = vmatpush.bf16.msrb.mxu1 %v1243_v19 }
 0x1ca   :  { %v361_v6 = vrot.slane %v360_v22, 1  ;;  %v475_v29 = vadd.f32 %v466_v26, %v426_v0 }
 0x1cc   :  { %v362_v31 = vmax.f32 %v360_v22, %v361_v6  ;;  %v483_v34 = vadd.f32 %v1265_v28, %v475_v29 }
 0x1cd   :  { %983 = vmatpush.bf16.msrb.mxu1 %v1242_v5 }
 0x1ce   :  { %v743_v35 = vsel %vm742_vm8, %v362_v31, %v355_v30  ;;  %v487_v38 = vmax.f32 %v483_v34, 0.0  ;;  %v597_v30 = vpop.f32.mrf.mxu0 }
 0x1cf   :  { %v753_v39 = vpack.c.bf16 %v743_v35, %v743_v35  ;;  %v397_v40 = vpop.f32.mrf.mxu3 }
 0x1d0   :  { %v469_v41 = vpop.f32.mrf.mxu2  ;;  %v429_v44 = vadd.f32 %v428_v23, %v397_v40  ;;  %v515_v46 = vsel %vm511_vm9, %v487_v38, 0.0  ;;  %v711_v40 = vpop.permute.xlu1 %710 }
 0x1d1   :  { %960 = vmatmul.bf16.vlgmr.msrb.gmra.mxu3 %v753_v39  ;;  %v518_v49 = vmax.f32 %v514_v47, %v515_v46  ;;  %v627_v59 = vpop.f32.mrf.mxu1  ;;  %984 = vmatpush.bf16.msrb.mxu1 %v1241_v33  ;;  %v1240_v39 = vld [vmem:[#allocation9 + $0x80] sm:$0xff]  ;;  %vm719_vm13 = vcmp.eq.s32.totalorder %v711_v40, 1 }
 0x1d2   :  { %v476_v48 = vadd.f32 %v469_v41, %v429_v44 }
 0x1d3   :  { %v519_v56 = vrot.slane %v518_v49, 4 }
 0x1d4   :  { %v484_v53 = vadd.f32 %v1265_v28, %v476_v48 }
 0x1d5   :  { %v520_v1 = vmax.f32 %v518_v49, %v519_v56  ;;  %985 = vmatpush.bf16.msrb.mxu1 %v1240_v39 }
 0x1d6   :  { %v488_v61 = vmax.f32 %v484_v53, 0.0 }
 0x1d7   :  { %v399_v51 = vpop.f32.mrf.mxu3  ;;  %v521_v10 = vrot.slane %v520_v1, 2 }
 0x1d8   :  { %v471_v52 = vpop.f32.mrf.mxu2  ;;  %v431_v54 = vadd.f32 %v430_v45, %v399_v51  ;;  %v516_v8 = vsel %vm512_vm12, %v488_v61, 0.0  ;;  %v708_v45 = vpop.permute.xlu0 %707 }
 0x1d9   :  { %v522_v17 = vmax.f32 %v520_v1, %v521_v10  ;;  %v629_v15 = vpop.f32.mrf.mxu1  ;;  %vm718_vm14 = vcmp.eq.s32.totalorder %v708_v45, 1  ;;  %v599_v51 = vpop.f32.mrf.mxu0 }
 0x1da   :  { %v477_v58 = vadd.f32 %v471_v52, %v431_v54 }
 0x1db   :  { %v523_v25 = vrot.slane %v522_v17, 1 }
 0x1dc   :  { %v485_v62 = vadd.f32 %v1265_v28, %v477_v58  ;;  %v1266_v28 = vld [vmem:[%s1610_s8] ss:$0 sm:$0xff] }
 0x1dd   :  { %v524_v31 = vmax.f32 %v522_v17, %v523_v25  ;;  %v1267_v25 = vld [vmem:[%s1612_s10] ss:$0 sm:$0xff] }
 0x1de   :  { %v489_v3 = vmax.f32 %v485_v62, 0.0  ;;  %v714_v62 = vpop.permute.xlu2 %713 }
 0x1df   :  { %v561_v4 = vpop.f32.mrf.mxu3  ;;  %vm720_vm0 = vcmp.eq.s32.totalorder %v714_v62, 1 }
 0x1e0   :  { %v672_v7 = vpop.f32.mrf.mxu2  ;;  %v517_v9 = vsel %vm513_vm11, %v489_v3, 0.0  ;;  %v593_v13 = vadd.f32 %v592_v55, %v561_v4  ;;  %v717_v61 = vpop.permute.xlu0 %716 }
 0x1e1   :  { %v525_v11 = vmax.f32 %v516_v8, %v517_v9  ;;  %v632_v36 = vpop.f32.mrf.mxu1  ;;  %vm721_vm15 = vcmp.eq.s32.totalorder %v717_v61, 1 }
 0x1e2   :  { %v637_v20 = vadd.f32 %v627_v59, %v593_v13 }
 0x1e3   :  { %v526_v16 = vrot.slane %v525_v11, 4 }
 0x1e4   :  { %v682_v27 = vadd.f32 %v672_v7, %v637_v20 }
 0x1e5   :  { %v527_v18 = vmax.f32 %v525_v11, %v526_v16 }
 0x1e6   :  { %v690_v34 = vadd.f32 %v1266_v28, %v682_v27 }
 0x1e7   :  { %v528_v21 = vrot.slane %v527_v18, 2  ;;  %v563_v23 = vpop.f32.mrf.mxu3 }
 0x1e8   :  { %v674_v24 = vpop.f32.mrf.mxu2  ;;  %v595_v22 = vadd.f32 %v594_v14, %v563_v23  ;;  %v694_v46 = vmax.f32 %v690_v34, 0.0 }
 0x1e9   :  { %v529_v26 = vmax.f32 %v527_v18, %v528_v21  ;;  %v634_v55 = vpop.f32.mrf.mxu1 }
 0x1ea   :  { %v638_v0 = vadd.f32 %v629_v15, %v595_v22  ;;  %v722_v49 = vsel %vm718_vm14, %v694_v46, 0.0 }
 0x1eb   :  { %v530_v6 = vrot.slane %v529_v26, 1 }
 0x1ec   :  { %v683_v29 = vadd.f32 %v674_v24, %v638_v0 }
 0x1ed   :  { %v531_v32 = vmax.f32 %v529_v26, %v530_v6 }
 0x1ee   :  { %v691_v35 = vadd.f32 %v1266_v28, %v683_v29 }
 0x1ef   :  { %v566_v37 = vpop.f32.mrf.mxu3  ;;  %v747_v38 = vsel %vm742_vm8, %v531_v32, %v524_v31 }
 0x1f0   :  { %v695_v41 = vmax.f32 %v691_v35, 0.0  ;;  %v598_v42 = vadd.f32 %v597_v30, %v566_v37  ;;  %v754_v43 = vpack.c.bf16 %v747_v38, %v747_v38  ;;  %v677_v44 = vpop.f32.mrf.mxu2 }
 0x1f2   :  { %v639_v47 = vadd.f32 %v632_v36, %v598_v42  ;;  %973 = vmatmul.bf16.vlgmr.msra.gmra.mxu0 %v754_v43  ;;  %v723_v48 = vsel %vm719_vm13, %v695_v41, 0.0 }
 0x1f3   :  { %v726_v52 = vmax.f32 %v722_v49, %v723_v48 }
 0x1f4   :  { %v684_v50 = vadd.f32 %v677_v44, %v639_v47 }
 0x1f5   :  { %v727_v58 = vrot.slane %v726_v52, 4 }
 0x1f6   :  { %v692_v56 = vadd.f32 %v1266_v28, %v684_v50 }
 0x1f7   :  { %v568_v53 = vpop.f32.mrf.mxu3  ;;  %v728_v2 = vmax.f32 %v726_v52, %v727_v58 }
 0x1f8   :  { %v600_v54 = vadd.f32 %v599_v51, %v568_v53  ;;  %v679_v59 = vpop.f32.mrf.mxu2  ;;  %v696_v63 = vmax.f32 %v692_v56, 0.0 }
 0x1f9   :  { %v729_v8 = vrot.slane %v728_v2, 2 }
 0x1fa   :  { %v640_v57 = vadd.f32 %v634_v55, %v600_v54  ;;  %v724_v4 = vsel %vm720_vm0, %v696_v63, 0.0 }
 0x1fb   :  { %v730_v11 = vmax.f32 %v728_v2, %v729_v8 }
 0x1fc   :  { %v685_v60 = vadd.f32 %v679_v59, %v640_v57 }
 0x1fd   :  { %v731_v14 = vrot.slane %v730_v11, 1 }
 0x1fe   :  { %v693_v1 = vadd.f32 %v1266_v28, %v685_v60 }
 0x1ff   :  { %v732_v18 = vmax.f32 %v730_v11, %v731_v14 }
 0x200   :  { %v697_v3 = vmax.f32 %v693_v1, 0.0 }
 0x202   :  { %v725_v7 = vsel %vm721_vm15, %v697_v3, 0.0 }
 0x203   :  { %v733_v9 = vmax.f32 %v724_v4, %v725_v7 }
 0x205   :  { %v734_v10 = vrot.slane %v733_v9, 4 }
 0x207   :  { %v735_v12 = vmax.f32 %v733_v9, %v734_v10 }
 0x209   :  { %v736_v13 = vrot.slane %v735_v12, 2 }
 0x20b   :  { %v737_v16 = vmax.f32 %v735_v12, %v736_v13 }
 0x20d   :  { %v738_v17 = vrot.slane %v737_v16, 1 }
 0x20f   :  { %v739_v15 = vmax.f32 %v737_v16, %v738_v17 }
 0x211   :  { %v751_v19 = vsel %vm742_vm8, %v739_v15, %v732_v18 }
 0x212   :  { %v755_v20 = vpack.c.bf16 %v751_v19, %v751_v19 }
 0x214   :  { %986 = vmatmul.bf16.vlgmr.msrb.gmra.mxu1 %v755_v20 }
 0x254   :  { %v961_v21 = vpop.f32.mrf.mxu3 }
 0x255   :  { %v962_v26 = vadd.f32 %v1267_v25, %v961_v21 }
 0x25c   :  { %v963_v23 = vpop.f32.mrf.mxu3 }
 0x26f   :  { %v974_v24 = vpop.f32.mrf.mxu0 }
 0x270   :  { %v975_v5 = vadd.f32 %v974_v24, %v962_v26 }
 0x277   :  { %v976_v22 = vpop.f32.mrf.mxu0 }
 0x291   :  { %v987_v27 = vpop.f32.mrf.mxu1 }
 0x292   :  { %v988_v28 = vadd.f32 %v987_v27, %v975_v5 }
 0x294   :  { %991 = vst [vmem:[#allocation11] sm:$0x3] %v988_v28 }
 0x295   :  { %1002 = dma.vmem_to_hbm [thread:$0]  %s998_s0, 32, %s1000_s12, [#allocation5]  }
 0x299   :  { %v989_v0 = vpop.f32.mrf.mxu1 }
 0x29a   :  { %1394 = dma.done.wait [#allocation5], 32  }
 0x29b   :  { %1395 = vsyncadd [#allocation5], 4294967264 }
 0x29c   :  { %1007 = vsyncpa [#allocation4], 1 }
 0x29d   :  { %1008 = vsyncpa [#allocation7], 1 }
 0x29e   :  { %1009 = vsyncpa [#allocation10], 1 }
 0x29f   :  { %1010 = vsyncpa [#allocation5], 1 }

</bundles_post_ra>
